<compile_context>
chip_gen: v7x
topology: tpu7x:2x2x1
jax: 0.10.0
libtpu: 0.0.40
codegen_flags: <defaults>
</compile_context>

<pallas_src>
import functools
import math

import jax
import jax.numpy as jnp
from jax import lax
from jax.experimental import pallas as pl
from jax.experimental.pallas import tpu as pltpu


# --------------------------------------------------------------------------
# Kernel 1: per-(batch, head-block) fused projection + attention
# --------------------------------------------------------------------------
def attn_block_kernel(q_ref, k_ref, v_ref, wq_ref, wk_ref, wv_ref,
                      ctx_ref, attn_ref, *, hb, d_k, d_v, scale):
    """One (batch, head-block) tile.

    q_ref/k_ref/v_ref : (1, L, d_model)       input activations for this batch
    wq_ref/wk_ref     : (d_model, hb*d_k)     combined weights for hb heads
    wv_ref            : (d_model, hb*d_v)
    ctx_ref           : (1, Lq, hb*d_v)       context, concat-heads layout
    attn_ref          : (1, hb, Lq, Lk)       attention probabilities
    """
    # Lane-dense projections for the whole head block (native input dtype,
    # f32 accumulation on the MXU).
    qh = jnp.dot(q_ref[0], wq_ref[...], preferred_element_type=jnp.float32)
    kh = jnp.dot(k_ref[0], wk_ref[...], preferred_element_type=jnp.float32)
    vh = jnp.dot(v_ref[0], wv_ref[...], preferred_element_type=jnp.float32)

    ctx_parts = []
    for h in range(hb):  # static, small
        qs = qh[:, h * d_k:(h + 1) * d_k] * scale     # (Lq, d_k)
        ks = kh[:, h * d_k:(h + 1) * d_k]             # (Lk, d_k)
        vs = vh[:, h * d_v:(h + 1) * d_v]             # (Lk, d_v)

        # scores = (q/sqrt(d_k)) @ k^T  -- contract last dims, no transpose copy
        s = lax.dot_general(qs, ks, (((1,), (1,)), ((), ())),
                            preferred_element_type=jnp.float32)   # (Lq, Lk)

        # numerically-stable softmax; reciprocal goes to the EUP slot
        m = jnp.max(s, axis=-1, keepdims=True)
        e = jnp.exp(s - m)
        inv = pl.reciprocal(jnp.sum(e, axis=-1, keepdims=True), approx=True)
        p = e * inv                                                 # (Lq, Lk)

        attn_ref[0, h, :, :] = p.astype(attn_ref.dtype)
        ctx_parts.append(jnp.dot(p, vs, preferred_element_type=jnp.float32))

    # One lane-dense store of the concatenated per-head contexts.
    ctx_ref[0, :, :] = jnp.concatenate(ctx_parts, axis=-1).astype(ctx_ref.dtype)


# --------------------------------------------------------------------------
# Kernel 2: fused fc projection + residual add + LayerNorm
# --------------------------------------------------------------------------
def fc_residual_ln_kernel(ctx_ref, wfc_ref, resid_ref, gamma_ref, beta_ref,
                          o_ref, *, eps):
    """One row tile of (B*Lq) tokens.

    ctx_ref   : (TM, H*d_v)    concatenated per-head contexts
    wfc_ref   : (H*d_v, d_model)
    resid_ref : (TM, d_model)  residual (original q)
    gamma/beta: (1, d_model)   LayerNorm affine params
    o_ref     : (TM, d_model)
    """
    y = jnp.dot(ctx_ref[...], wfc_ref[...], preferred_element_type=jnp.float32)
    y = y + resid_ref[...].astype(jnp.float32)

    mean = jnp.mean(y, axis=-1, keepdims=True)
    var = jnp.mean(jnp.square(y - mean), axis=-1, keepdims=True)
    yn = (y - mean) * lax.rsqrt(var + eps)
    out = yn * gamma_ref[...] + beta_ref[...]

    o_ref[...] = out.astype(o_ref.dtype)


# --------------------------------------------------------------------------
# Tiling helpers
# --------------------------------------------------------------------------
def _heads_per_block(n_head, d_k, d_v, lane_target=256):
    """Smallest head-block with >= lane_target MXU columns (128-aligned),
    else all heads (full-dim blocks are always layout-legal)."""
    for hb in range(1, n_head):
        if (n_head % hb == 0 and hb * d_k >= lane_target
                and (hb * d_k) % 128 == 0 and (hb * d_v) % 128 == 0):
            return hb
    return n_head


def _pick_row_tile(n, row_bytes, target_bytes=8 << 20):
    """Largest TM dividing n with TM % 8 == 0 (or TM == n), sized by bytes.

    Kernel 2 is HBM-bandwidth bound: multi-MiB row tiles approach roofline,
    tiny tiles pay ~0.35 us/step of fixed overhead.
    """
    cap = min(n, max(8, target_bytes // max(row_bytes, 1)))
    tm = (cap // 8) * 8
    while tm >= 8:
        if n % tm == 0:
            return tm
        tm -= 8
    return n  # tiny problems: one full-array block


_VMEM_LIMIT = 32 * 1024 * 1024  # safe on v5e/v6e/v7x; raise on v5e/v6e for big shapes


# --------------------------------------------------------------------------
# Wrapper: MultiHeadAttention.forward (eval mode)
# --------------------------------------------------------------------------
@functools.partial(jax.jit, static_argnames=("n_head", "d_k", "d_v"))
def mha_forward(q, k, v, params, *, n_head, d_k, d_v):
    """Returns (out, attn) like MultiHeadAttention.forward with mask=None."""
    B, Lq, D = q.shape
    _, Lk, _ = k.shape
    _, Lv, _ = v.shape
    assert Lk == Lv, "attention requires len_k == len_v"
    H = n_head
    eps = 1e-6

    hb = _heads_per_block(H, d_k, d_v)
    n_hblk = H // hb
    scale = 1.0 / math.sqrt(d_k)

    ctx, attn = pl.pallas_call(
        functools.partial(attn_block_kernel, hb=hb, d_k=d_k, d_v=d_v,
                          scale=scale),
        out_shape=(
            jax.ShapeDtypeStruct((B, Lq, H * d_v), q.dtype),   # concat-heads layout
            jax.ShapeDtypeStruct((B, H, Lq, Lk), q.dtype),
        ),
        grid_spec=pltpu.PrefetchScalarGridSpec(
            num_scalar_prefetch=0,
            grid=(B, n_hblk),
            in_specs=[
                pl.BlockSpec((1, Lq, D), lambda b, g: (b, 0, 0)),
                pl.BlockSpec((1, Lk, D), lambda b, g: (b, 0, 0)),
                pl.BlockSpec((1, Lv, D), lambda b, g: (b, 0, 0)),
                pl.BlockSpec((D, hb * d_k), lambda b, g: (0, g)),
                pl.BlockSpec((D, hb * d_k), lambda b, g: (0, g)),
                pl.BlockSpec((D, hb * d_v), lambda b, g: (0, g)),
            ],
            out_specs=[
                pl.BlockSpec((1, Lq, hb * d_v), lambda b, g: (b, 0, g)),
                pl.BlockSpec((1, hb, Lq, Lk), lambda b, g: (b, g, 0, 0)),
            ],
        ),
        compiler_params=pltpu.CompilerParams(
            dimension_semantics=("parallel", "parallel"),
            vmem_limit_bytes=_VMEM_LIMIT),
    )(q, k, v, params["w_qs"], params["w_ks"], params["w_vs"])

    # ctx is already in (B, Lq, H*d_v) concat-heads layout: free reshape.
    ctx2 = ctx.reshape(B * Lq, H * d_v)
    resid = q.reshape(B * Lq, D)

    N = B * Lq
    row_bytes = (H * d_v + 2 * D) * jnp.dtype(q.dtype).itemsize
    TM = _pick_row_tile(N, row_bytes)
    grid = (N // TM,)

    out = pl.pallas_call(
        functools.partial(fc_residual_ln_kernel, eps=eps),
        out_shape=jax.ShapeDtypeStruct((N, D), q.dtype),
        grid_spec=pltpu.PrefetchScalarGridSpec(
            num_scalar_prefetch=0,
            grid=grid,
            in_specs=[
                pl.BlockSpec((TM, H * d_v), lambda i: (i, 0)),
                pl.BlockSpec((H * d_v, D), lambda i: (0, 0)),
                pl.BlockSpec((TM, D), lambda i: (i, 0)),
                pl.BlockSpec((1, D), lambda i: (0, 0)),
                pl.BlockSpec((1, D), lambda i: (0, 0)),
            ],
            out_specs=pl.BlockSpec((TM, D), lambda i: (i, 0)),
        ),
        compiler_params=pltpu.CompilerParams(
            dimension_semantics=("parallel",),
            vmem_limit_bytes=_VMEM_LIMIT),
    )(ctx2, params["w_fc"], resid,
      params["ln_gamma"].reshape(1, D), params["ln_beta"].reshape(1, D))

    return out.reshape(B, Lq, D), attn


# --------------------------------------------------------------------------
# Pure-JAX reference (eval-mode MultiHeadAttention) for correctness checks
# --------------------------------------------------------------------------
def mha_reference(q, k, v, params, n_head, d_k, d_v):
    B, Lq, D = q.shape
    qh = (q @ params["w_qs"]).reshape(B, Lq, n_head, d_k).transpose(0, 2, 1, 3)
    kh = (k @ params["w_ks"]).reshape(B, -1, n_head, d_k).transpose(0, 2, 1, 3)
    vh = (v @ params["w_vs"]).reshape(B, -1, n_head, d_v).transpose(0, 2, 1, 3)
    s = jnp.einsum("bhqd,bhkd->bhqk", qh / math.sqrt(d_k), kh)
    attn = jax.nn.softmax(s, axis=-1)
    ctx = jnp.einsum("bhqk,bhkd->bhqd", attn, vh)
    ctx = ctx.transpose(0, 2, 1, 3).reshape(B, Lq, n_head * d_v)
    y = ctx @ params["w_fc"] + q
    mean = y.mean(-1, keepdims=True)
    var = ((y - mean) ** 2).mean(-1, keepdims=True)
    out = (y - mean) / jnp.sqrt(var + 1e-6) * params["ln_gamma"] + params["ln_beta"]
    return out, attn


if __name__ == "__main__":
    key = jax.random.PRNGKey(0)
    B, L, d_model, n_head, d_k, d_v = 2, 8, 32, 4, 8, 8

    k1, k2, k3, k4, k5, k6, k7 = jax.random.split(key, 7)
    q = jax.random.normal(k1, (B, L, d_model), jnp.float32)
    k_in = jax.random.normal(k2, (B, L, d_model), jnp.float32)
    v_in = jax.random.normal(k3, (B, L, d_model), jnp.float32)

    # Weights stored in the "x @ W" convention (equivalent to PyTorch's
    # Linear weight transposed); LayerNorm at default init (gamma=1, beta=0).
    sc = 1.0 / math.sqrt(d_model)
    params = {
        "w_qs": sc * jax.random.normal(k4, (d_model, n_head * d_k), jnp.float32),
        "w_ks": sc * jax.random.normal(k5, (d_model, n_head * d_k), jnp.float32),
        "w_vs": sc * jax.random.normal(k6, (d_model, n_head * d_v), jnp.float32),
        "w_fc": sc * jax.random.normal(k7, (n_head * d_v, d_model), jnp.float32),
        "ln_gamma": jnp.ones((d_model,), jnp.float32),
        "ln_beta": jnp.zeros((d_model,), jnp.float32),
    }

    out, attn = mha_forward(q, k_in, v_in, params,
                            n_head=n_head, d_k=d_k, d_v=d_v)
    jax.block_until_ready((out, attn))

    out_ref, attn_ref = mha_reference(q, k_in, v_in, params, n_head, d_k, d_v)

    assert out.shape == (B, L, d_model)
    assert attn.shape == (B, n_head, L, L)
    # Tolerances loosened slightly for pl.reciprocal(approx=True) in softmax.
    assert jnp.allclose(attn, attn_ref, atol=2e-3, rtol=2e-3)
    assert jnp.allclose(out, out_ref, atol=5e-3, rtol=5e-3)

    print("KERNEL_OK")
</pallas_src>

<mosaic_0001>
module attributes {stable_mosaic.version = 11 : i64} {
  func.func @fc_residual_ln_kernel(%arg0: i32, %arg1: memref<16x32xf32, #tpu.memory_space<vmem>>, %arg2: memref<32x32xf32, #tpu.memory_space<vmem>>, %arg3: memref<16x32xf32, #tpu.memory_space<vmem>>, %arg4: memref<1x32xf32, #tpu.memory_space<vmem>>, %arg5: memref<1x32xf32, #tpu.memory_space<vmem>>, %arg6: memref<16x32xf32, #tpu.memory_space<vmem>>) attributes {dimension_semantics = [#tpu.dimension_semantics<parallel>], iteration_bounds = array<i64: 1>, scalar_prefetch = 0 : i64, scratch_operands = 0 : i64, tpu.core_type = #tpu.core_type<tc>, window_params = [{transform_indices = @transform_0, window_bounds = array<i64: 16, 32>}, {pipeline_mode = #tpu.pipeline_mode<synchronous>, transform_indices = @transform_1, window_bounds = array<i64: 32, 32>}, {transform_indices = @transform_2, window_bounds = array<i64: 16, 32>}, {pipeline_mode = #tpu.pipeline_mode<synchronous>, transform_indices = @transform_3, window_bounds = array<i64: 1, 32>}, {pipeline_mode = #tpu.pipeline_mode<synchronous>, transform_indices = @transform_4, window_bounds = array<i64: 1, 32>}, {transform_indices = @transform_5, window_bounds = array<i64: 16, 32>}]} {
    %c0 = arith.constant 0 : index
    %c0_0 = arith.constant 0 : index
    %0 = vector.load %arg1[%c0, %c0_0] : memref<16x32xf32, #tpu.memory_space<vmem>>, vector<16x32xf32>
    %c0_1 = arith.constant 0 : index
    %c0_2 = arith.constant 0 : index
    %1 = vector.load %arg2[%c0_1, %c0_2] : memref<32x32xf32, #tpu.memory_space<vmem>>, vector<32x32xf32>
    %cst = arith.constant dense<0.000000e+00> : vector<16x32xf32>
    %2 = tpu.matmul %0, %1, %cst {dimension_numbers = #tpu.dot_dimension_numbers<[1], [0], [0], [1], [0, 0, 1, 1], [], []>} : vector<16x32xf32>, vector<32x32xf32>, vector<16x32xf32> -> vector<16x32xf32>
    %c0_3 = arith.constant 0 : index
    %c0_4 = arith.constant 0 : index
    %3 = vector.load %arg3[%c0_3, %c0_4] : memref<16x32xf32, #tpu.memory_space<vmem>>, vector<16x32xf32>
    %4 = arith.addf %2, %3 : vector<16x32xf32>
    %cst_5 = arith.constant dense<0.000000e+00> : vector<16xf32>
    %5 = vector.multi_reduction <add>, %4, %cst_5 [1] : vector<16x32xf32> to vector<16xf32>
    %6 = vector.shape_cast %5 : vector<16xf32> to vector<16x1xf32>
    %cst_6 = arith.constant 3.200000e+01 : f32
    %7 = vector.broadcast %cst_6 : f32 to vector<16x1xf32>
    %8 = arith.divf %6, %7 : vector<16x1xf32>
    %9 = vector.broadcast %8 : vector<16x1xf32> to vector<16x32xf32>
    %10 = arith.subf %4, %9 : vector<16x32xf32>
    %11 = arith.mulf %10, %10 : vector<16x32xf32>
    %cst_7 = arith.constant dense<0.000000e+00> : vector<16xf32>
    %12 = vector.multi_reduction <add>, %11, %cst_7 [1] : vector<16x32xf32> to vector<16xf32>
    %13 = vector.shape_cast %12 : vector<16xf32> to vector<16x1xf32>
    %cst_8 = arith.constant 3.200000e+01 : f32
    %14 = vector.broadcast %cst_8 : f32 to vector<16x1xf32>
    %15 = arith.divf %13, %14 : vector<16x1xf32>
    %16 = vector.broadcast %8 : vector<16x1xf32> to vector<16x32xf32>
    %17 = arith.subf %4, %16 : vector<16x32xf32>
    %cst_9 = arith.constant 9.99999997E-7 : f32
    %18 = vector.broadcast %cst_9 : f32 to vector<16x1xf32>
    %19 = arith.addf %15, %18 : vector<16x1xf32>
    %20 = math.rsqrt %19 : vector<16x1xf32>
    %21 = vector.broadcast %20 : vector<16x1xf32> to vector<16x32xf32>
    %22 = arith.mulf %17, %21 : vector<16x32xf32>
    %c0_10 = arith.constant 0 : index
    %c0_11 = arith.constant 0 : index
    %23 = vector.load %arg4[%c0_10, %c0_11] : memref<1x32xf32, #tpu.memory_space<vmem>>, vector<1x32xf32>
    %24 = vector.broadcast %23 : vector<1x32xf32> to vector<16x32xf32>
    %25 = arith.mulf %22, %24 : vector<16x32xf32>
    %c0_12 = arith.constant 0 : index
    %c0_13 = arith.constant 0 : index
    %26 = vector.load %arg5[%c0_12, %c0_13] : memref<1x32xf32, #tpu.memory_space<vmem>>, vector<1x32xf32>
    %27 = vector.broadcast %26 : vector<1x32xf32> to vector<16x32xf32>
    %28 = arith.addf %25, %27 : vector<16x32xf32>
    %c0_14 = arith.constant 0 : index
    %c0_15 = arith.constant 0 : index
    %29 = vector.load %arg6[%c0_14, %c0_15] : memref<16x32xf32, #tpu.memory_space<vmem>>, vector<16x32xf32>
    tpu.vector_store %arg6[%c0_14, %c0_15], %28 {strides = array<i32>} : memref<16x32xf32, #tpu.memory_space<vmem>>, vector<16x32xf32>,
    return
  }
  func.func @transform_0(%arg0: i32) -> (i32, i32) {
    %c0_i32 = arith.constant 0 : i32
    %c0_i32_0 = arith.constant 0 : i32
    return %arg0, %c0_i32 : i32, i32
  }
  func.func @transform_1(%arg0: i32) -> (i32, i32) {
    %c0_i32 = arith.constant 0 : i32
    %c0_i32_0 = arith.constant 0 : i32
    %c0_i32_1 = arith.constant 0 : i32
    return %c0_i32, %c0_i32_0 : i32, i32
  }
  func.func @transform_2(%arg0: i32) -> (i32, i32) {
    %c0_i32 = arith.constant 0 : i32
    %c0_i32_0 = arith.constant 0 : i32
    return %arg0, %c0_i32 : i32, i32
  }
  func.func @transform_3(%arg0: i32) -> (i32, i32) {
    %c0_i32 = arith.constant 0 : i32
    %c0_i32_0 = arith.constant 0 : i32
    %c0_i32_1 = arith.constant 0 : i32
    return %c0_i32, %c0_i32_0 : i32, i32
  }
  func.func @transform_4(%arg0: i32) -> (i32, i32) {
    %c0_i32 = arith.constant 0 : i32
    %c0_i32_0 = arith.constant 0 : i32
    %c0_i32_1 = arith.constant 0 : i32
    return %c0_i32, %c0_i32_0 : i32, i32
  }
  func.func @transform_5(%arg0: i32) -> (i32, i32) {
    %c0_i32 = arith.constant 0 : i32
    %c0_i32_0 = arith.constant 0 : i32
    return %arg0, %c0_i32 : i32, i32
  }
}

module attributes {stable_mosaic.version = 11 : i64} {
  func.func @attn_block_kernel(%arg0: i32, %arg1: i32, %arg2: memref<1x8x32xf32, #tpu.memory_space<vmem>>, %arg3: memref<1x8x32xf32, #tpu.memory_space<vmem>>, %arg4: memref<1x8x32xf32, #tpu.memory_space<vmem>>, %arg5: memref<32x32xf32, #tpu.memory_space<vmem>>, %arg6: memref<32x32xf32, #tpu.memory_space<vmem>>, %arg7: memref<32x32xf32, #tpu.memory_space<vmem>>, %arg8: memref<1x8x32xf32, #tpu.memory_space<vmem>>, %arg9: memref<1x4x8x8xf32, #tpu.memory_space<vmem>>) attributes {dimension_semantics = [#tpu.dimension_semantics<parallel>, #tpu.dimension_semantics<parallel>], iteration_bounds = array<i64: 2, 1>, scalar_prefetch = 0 : i64, scratch_operands = 0 : i64, tpu.core_type = #tpu.core_type<tc>, window_params = [{transform_indices = @transform_0, window_bounds = array<i64: 1, 8, 32>}, {transform_indices = @transform_1, window_bounds = array<i64: 1, 8, 32>}, {transform_indices = @transform_2, window_bounds = array<i64: 1, 8, 32>}, {transform_indices = @transform_3, window_bounds = array<i64: 32, 32>}, {transform_indices = @transform_4, window_bounds = array<i64: 32, 32>}, {transform_indices = @transform_5, window_bounds = array<i64: 32, 32>}, {transform_indices = @transform_6, window_bounds = array<i64: 1, 8, 32>}, {transform_indices = @transform_7, window_bounds = array<i64: 1, 4, 8, 8>}]} {
    %c0 = arith.constant 0 : index
    %c0_0 = arith.constant 0 : index
    %c0_1 = arith.constant 0 : index
    %0 = vector.load %arg2[%c0, %c0_0, %c0_1] : memref<1x8x32xf32, #tpu.memory_space<vmem>>, vector<1x8x32xf32>
    %1 = vector.shape_cast %0 : vector<1x8x32xf32> to vector<8x32xf32>
    %c0_2 = arith.constant 0 : index
    %c0_3 = arith.constant 0 : index
    %2 = vector.load %arg5[%c0_2, %c0_3] : memref<32x32xf32, #tpu.memory_space<vmem>>, vector<32x32xf32>
    %cst = arith.constant dense<0.000000e+00> : vector<8x32xf32>
    %3 = tpu.matmul %1, %2, %cst {dimension_numbers = #tpu.dot_dimension_numbers<[1], [0], [0], [1], [0, 0, 1, 1], [], []>} : vector<8x32xf32>, vector<32x32xf32>, vector<8x32xf32> -> vector<8x32xf32>
    %c0_4 = arith.constant 0 : index
    %c0_5 = arith.constant 0 : index
    %c0_6 = arith.constant 0 : index
    %4 = vector.load %arg3[%c0_4, %c0_5, %c0_6] : memref<1x8x32xf32, #tpu.memory_space<vmem>>, vector<1x8x32xf32>
    %5 = vector.shape_cast %4 : vector<1x8x32xf32> to vector<8x32xf32>
    %c0_7 = arith.constant 0 : index
    %c0_8 = arith.constant 0 : index
    %6 = vector.load %arg6[%c0_7, %c0_8] : memref<32x32xf32, #tpu.memory_space<vmem>>, vector<32x32xf32>
    %cst_9 = arith.constant dense<0.000000e+00> : vector<8x32xf32>
    %7 = tpu.matmul %5, %6, %cst_9 {dimension_numbers = #tpu.dot_dimension_numbers<[1], [0], [0], [1], [0, 0, 1, 1], [], []>} : vector<8x32xf32>, vector<32x32xf32>, vector<8x32xf32> -> vector<8x32xf32>
    %c0_10 = arith.constant 0 : index
    %c0_11 = arith.constant 0 : index
    %c0_12 = arith.constant 0 : index
    %8 = vector.load %arg4[%c0_10, %c0_11, %c0_12] : memref<1x8x32xf32, #tpu.memory_space<vmem>>, vector<1x8x32xf32>
    %9 = vector.shape_cast %8 : vector<1x8x32xf32> to vector<8x32xf32>
    %c0_13 = arith.constant 0 : index
    %c0_14 = arith.constant 0 : index
    %10 = vector.load %arg7[%c0_13, %c0_14] : memref<32x32xf32, #tpu.memory_space<vmem>>, vector<32x32xf32>
    %cst_15 = arith.constant dense<0.000000e+00> : vector<8x32xf32>
    %11 = tpu.matmul %9, %10, %cst_15 {dimension_numbers = #tpu.dot_dimension_numbers<[1], [0], [0], [1], [0, 0, 1, 1], [], []>} : vector<8x32xf32>, vector<32x32xf32>, vector<8x32xf32> -> vector<8x32xf32>
    %12 = vector.extract_strided_slice %3 {offsets = [0, 0], sizes = [8, 8], strides = [1, 1]} : vector<8x32xf32> to vector<8x8xf32>
    %cst_16 = arith.constant 0.353553385 : f32
    %13 = vector.broadcast %cst_16 : f32 to vector<8x8xf32>
    %14 = arith.mulf %12, %13 : vector<8x8xf32>
    %15 = vector.extract_strided_slice %7 {offsets = [0, 0], sizes = [8, 8], strides = [1, 1]} : vector<8x32xf32> to vector<8x8xf32>
    %16 = vector.extract_strided_slice %11 {offsets = [0, 0], sizes = [8, 8], strides = [1, 1]} : vector<8x32xf32> to vector<8x8xf32>
    %cst_17 = arith.constant dense<0.000000e+00> : vector<8x8xf32>
    %17 = tpu.matmul %14, %15, %cst_17 {dimension_numbers = #tpu.dot_dimension_numbers<[1], [1], [0], [0], [0, 0, 1, 0], [], []>} : vector<8x8xf32>, vector<8x8xf32>, vector<8x8xf32> -> vector<8x8xf32>
    %cst_18 = arith.constant dense<0xFF800000> : vector<8xf32>
    %18 = vector.multi_reduction <maximumf>, %17, %cst_18 [1] : vector<8x8xf32> to vector<8xf32>
    %19 = vector.shape_cast %18 : vector<8xf32> to vector<8x1xf32>
    %20 = vector.broadcast %19 : vector<8x1xf32> to vector<8x8xf32>
    %21 = arith.subf %17, %20 : vector<8x8xf32>
    %22 = math.exp %21 : vector<8x8xf32>
    %cst_19 = arith.constant dense<0.000000e+00> : vector<8xf32>
    %23 = vector.multi_reduction <add>, %22, %cst_19 [1] : vector<8x8xf32> to vector<8xf32>
    %24 = vector.shape_cast %23 : vector<8xf32> to vector<8x1xf32>
    %25 = tpu.reciprocal %24 {approx = true} : vector<8x1xf32> -> vector<8x1xf32>
    %26 = vector.broadcast %25 : vector<8x1xf32> to vector<8x8xf32>
    %27 = arith.mulf %22, %26 : vector<8x8xf32>
    %c0_20 = arith.constant 0 : index
    %c0_21 = arith.constant 0 : index
    %c0_22 = arith.constant 0 : index
    %c0_23 = arith.constant 0 : index
    %28 = vector.load %arg9[%c0_20, %c0_21, %c0_22, %c0_23] : memref<1x4x8x8xf32, #tpu.memory_space<vmem>>, vector<1x1x8x8xf32>
    %29 = vector.shape_cast %28 : vector<1x1x8x8xf32> to vector<8x8xf32>
    %30 = vector.shape_cast %27 : vector<8x8xf32> to vector<1x1x8x8xf32>
    tpu.vector_store %arg9[%c0_20, %c0_21, %c0_22, %c0_23], %30 {strides = array<i32>} : memref<1x4x8x8xf32, #tpu.memory_space<vmem>>, vector<1x1x8x8xf32>,
    %cst_24 = arith.constant dense<0.000000e+00> : vector<8x8xf32>
    %31 = tpu.matmul %27, %16, %cst_24 {dimension_numbers = #tpu.dot_dimension_numbers<[1], [0], [0], [1], [0, 0, 1, 1], [], []>} : vector<8x8xf32>, vector<8x8xf32>, vector<8x8xf32> -> vector<8x8xf32>
    %32 = vector.extract_strided_slice %3 {offsets = [0, 8], sizes = [8, 8], strides = [1, 1]} : vector<8x32xf32> to vector<8x8xf32>
    %cst_25 = arith.constant 0.353553385 : f32
    %33 = vector.broadcast %cst_25 : f32 to vector<8x8xf32>
    %34 = arith.mulf %32, %33 : vector<8x8xf32>
    %35 = vector.extract_strided_slice %7 {offsets = [0, 8], sizes = [8, 8], strides = [1, 1]} : vector<8x32xf32> to vector<8x8xf32>
    %36 = vector.extract_strided_slice %11 {offsets = [0, 8], sizes = [8, 8], strides = [1, 1]} : vector<8x32xf32> to vector<8x8xf32>
    %cst_26 = arith.constant dense<0.000000e+00> : vector<8x8xf32>
    %37 = tpu.matmul %34, %35, %cst_26 {dimension_numbers = #tpu.dot_dimension_numbers<[1], [1], [0], [0], [0, 0, 1, 0], [], []>} : vector<8x8xf32>, vector<8x8xf32>, vector<8x8xf32> -> vector<8x8xf32>
    %cst_27 = arith.constant dense<0xFF800000> : vector<8xf32>
    %38 = vector.multi_reduction <maximumf>, %37, %cst_27 [1] : vector<8x8xf32> to vector<8xf32>
    %39 = vector.shape_cast %38 : vector<8xf32> to vector<8x1xf32>
    %40 = vector.broadcast %39 : vector<8x1xf32> to vector<8x8xf32>
    %41 = arith.subf %37, %40 : vector<8x8xf32>
    %42 = math.exp %41 : vector<8x8xf32>
    %cst_28 = arith.constant dense<0.000000e+00> : vector<8xf32>
    %43 = vector.multi_reduction <add>, %42, %cst_28 [1] : vector<8x8xf32> to vector<8xf32>
    %44 = vector.shape_cast %43 : vector<8xf32> to vector<8x1xf32>
    %45 = tpu.reciprocal %44 {approx = true} : vector<8x1xf32> -> vector<8x1xf32>
    %46 = vector.broadcast %45 : vector<8x1xf32> to vector<8x8xf32>
    %47 = arith.mulf %42, %46 : vector<8x8xf32>
    %c0_29 = arith.constant 0 : index
    %c1 = arith.constant 1 : index
    %c0_30 = arith.constant 0 : index
    %c0_31 = arith.constant 0 : index
    %48 = vector.load %arg9[%c0_29, %c1, %c0_30, %c0_31] : memref<1x4x8x8xf32, #tpu.memory_space<vmem>>, vector<1x1x8x8xf32>
    %49 = vector.shape_cast %48 : vector<1x1x8x8xf32> to vector<8x8xf32>
    %50 = vector.shape_cast %47 : vector<8x8xf32> to vector<1x1x8x8xf32>
    tpu.vector_store %arg9[%c0_29, %c1, %c0_30, %c0_31], %50 {strides = array<i32>} : memref<1x4x8x8xf32, #tpu.memory_space<vmem>>, vector<1x1x8x8xf32>,
    %cst_32 = arith.constant dense<0.000000e+00> : vector<8x8xf32>
    %51 = tpu.matmul %47, %36, %cst_32 {dimension_numbers = #tpu.dot_dimension_numbers<[1], [0], [0], [1], [0, 0, 1, 1], [], []>} : vector<8x8xf32>, vector<8x8xf32>, vector<8x8xf32> -> vector<8x8xf32>
    %52 = vector.extract_strided_slice %3 {offsets = [0, 16], sizes = [8, 8], strides = [1, 1]} : vector<8x32xf32> to vector<8x8xf32>
    %cst_33 = arith.constant 0.353553385 : f32
    %53 = vector.broadcast %cst_33 : f32 to vector<8x8xf32>
    %54 = arith.mulf %52, %53 : vector<8x8xf32>
    %55 = vector.extract_strided_slice %7 {offsets = [0, 16], sizes = [8, 8], strides = [1, 1]} : vector<8x32xf32> to vector<8x8xf32>
    %56 = vector.extract_strided_slice %11 {offsets = [0, 16], sizes = [8, 8], strides = [1, 1]} : vector<8x32xf32> to vector<8x8xf32>
    %cst_34 = arith.constant dense<0.000000e+00> : vector<8x8xf32>
    %57 = tpu.matmul %54, %55, %cst_34 {dimension_numbers = #tpu.dot_dimension_numbers<[1], [1], [0], [0], [0, 0, 1, 0], [], []>} : vector<8x8xf32>, vector<8x8xf32>, vector<8x8xf32> -> vector<8x8xf32>
    %cst_35 = arith.constant dense<0xFF800000> : vector<8xf32>
    %58 = vector.multi_reduction <maximumf>, %57, %cst_35 [1] : vector<8x8xf32> to vector<8xf32>
    %59 = vector.shape_cast %58 : vector<8xf32> to vector<8x1xf32>
    %60 = vector.broadcast %59 : vector<8x1xf32> to vector<8x8xf32>
    %61 = arith.subf %57, %60 : vector<8x8xf32>
    %62 = math.exp %61 : vector<8x8xf32>
    %cst_36 = arith.constant dense<0.000000e+00> : vector<8xf32>
    %63 = vector.multi_reduction <add>, %62, %cst_36 [1] : vector<8x8xf32> to vector<8xf32>
    %64 = vector.shape_cast %63 : vector<8xf32> to vector<8x1xf32>
    %65 = tpu.reciprocal %64 {approx = true} : vector<8x1xf32> -> vector<8x1xf32>
    %66 = vector.broadcast %65 : vector<8x1xf32> to vector<8x8xf32>
    %67 = arith.mulf %62, %66 : vector<8x8xf32>
    %c0_37 = arith.constant 0 : index
    %c2 = arith.constant 2 : index
    %c0_38 = arith.constant 0 : index
    %c0_39 = arith.constant 0 : index
    %68 = vector.load %arg9[%c0_37, %c2, %c0_38, %c0_39] : memref<1x4x8x8xf32, #tpu.memory_space<vmem>>, vector<1x1x8x8xf32>
    %69 = vector.shape_cast %68 : vector<1x1x8x8xf32> to vector<8x8xf32>
    %70 = vector.shape_cast %67 : vector<8x8xf32> to vector<1x1x8x8xf32>
    tpu.vector_store %arg9[%c0_37, %c2, %c0_38, %c0_39], %70 {strides = array<i32>} : memref<1x4x8x8xf32, #tpu.memory_space<vmem>>, vector<1x1x8x8xf32>,
    %cst_40 = arith.constant dense<0.000000e+00> : vector<8x8xf32>
    %71 = tpu.matmul %67, %56, %cst_40 {dimension_numbers = #tpu.dot_dimension_numbers<[1], [0], [0], [1], [0, 0, 1, 1], [], []>} : vector<8x8xf32>, vector<8x8xf32>, vector<8x8xf32> -> vector<8x8xf32>
    %72 = vector.extract_strided_slice %3 {offsets = [0, 24], sizes = [8, 8], strides = [1, 1]} : vector<8x32xf32> to vector<8x8xf32>
    %cst_41 = arith.constant 0.353553385 : f32
    %73 = vector.broadcast %cst_41 : f32 to vector<8x8xf32>
    %74 = arith.mulf %72, %73 : vector<8x8xf32>
    %75 = vector.extract_strided_slice %7 {offsets = [0, 24], sizes = [8, 8], strides = [1, 1]} : vector<8x32xf32> to vector<8x8xf32>
    %76 = vector.extract_strided_slice %11 {offsets = [0, 24], sizes = [8, 8], strides = [1, 1]} : vector<8x32xf32> to vector<8x8xf32>
    %cst_42 = arith.constant dense<0.000000e+00> : vector<8x8xf32>
    %77 = tpu.matmul %74, %75, %cst_42 {dimension_numbers = #tpu.dot_dimension_numbers<[1], [1], [0], [0], [0, 0, 1, 0], [], []>} : vector<8x8xf32>, vector<8x8xf32>, vector<8x8xf32> -> vector<8x8xf32>
    %cst_43 = arith.constant dense<0xFF800000> : vector<8xf32>
    %78 = vector.multi_reduction <maximumf>, %77, %cst_43 [1] : vector<8x8xf32> to vector<8xf32>
    %79 = vector.shape_cast %78 : vector<8xf32> to vector<8x1xf32>
    %80 = vector.broadcast %79 : vector<8x1xf32> to vector<8x8xf32>
    %81 = arith.subf %77, %80 : vector<8x8xf32>
    %82 = math.exp %81 : vector<8x8xf32>
    %cst_44 = arith.constant dense<0.000000e+00> : vector<8xf32>
    %83 = vector.multi_reduction <add>, %82, %cst_44 [1] : vector<8x8xf32> to vector<8xf32>
    %84 = vector.shape_cast %83 : vector<8xf32> to vector<8x1xf32>
    %85 = tpu.reciprocal %84 {approx = true} : vector<8x1xf32> -> vector<8x1xf32>
    %86 = vector.broadcast %85 : vector<8x1xf32> to vector<8x8xf32>
    %87 = arith.mulf %82, %86 : vector<8x8xf32>
    %c0_45 = arith.constant 0 : index
    %c3 = arith.constant 3 : index
    %c0_46 = arith.constant 0 : index
    %c0_47 = arith.constant 0 : index
    %88 = vector.load %arg9[%c0_45, %c3, %c0_46, %c0_47] : memref<1x4x8x8xf32, #tpu.memory_space<vmem>>, vector<1x1x8x8xf32>
    %89 = vector.shape_cast %88 : vector<1x1x8x8xf32> to vector<8x8xf32>
    %90 = vector.shape_cast %87 : vector<8x8xf32> to vector<1x1x8x8xf32>
    tpu.vector_store %arg9[%c0_45, %c3, %c0_46, %c0_47], %90 {strides = array<i32>} : memref<1x4x8x8xf32, #tpu.memory_space<vmem>>, vector<1x1x8x8xf32>,
    %cst_48 = arith.constant dense<0.000000e+00> : vector<8x8xf32>
    %91 = tpu.matmul %87, %76, %cst_48 {dimension_numbers = #tpu.dot_dimension_numbers<[1], [0], [0], [1], [0, 0, 1, 1], [], []>} : vector<8x8xf32>, vector<8x8xf32>, vector<8x8xf32> -> vector<8x8xf32>
    %92 = tpu.concatenate %31, %51, %71, %91 in 1 : vector<8x8xf32>, vector<8x8xf32>, vector<8x8xf32>, vector<8x8xf32> -> vector<8x32xf32>
    %c0_49 = arith.constant 0 : index
    %c0_50 = arith.constant 0 : index
    %c0_51 = arith.constant 0 : index
    %93 = vector.load %arg8[%c0_49, %c0_50, %c0_51] : memref<1x8x32xf32, #tpu.memory_space<vmem>>, vector<1x8x32xf32>
    %94 = vector.shape_cast %93 : vector<1x8x32xf32> to vector<8x32xf32>
    %95 = vector.shape_cast %92 : vector<8x32xf32> to vector<1x8x32xf32>
    tpu.vector_store %arg8[%c0_49, %c0_50, %c0_51], %95 {strides = array<i32>} : memref<1x8x32xf32, #tpu.memory_space<vmem>>, vector<1x8x32xf32>,
    return
  }
  func.func @transform_0(%arg0: i32, %arg1: i32) -> (i32, i32, i32) {
    %c0_i32 = arith.constant 0 : i32
    %c0_i32_0 = arith.constant 0 : i32
    %c0_i32_1 = arith.constant 0 : i32
    return %arg0, %c0_i32, %c0_i32_0 : i32, i32, i32
  }
  func.func @transform_1(%arg0: i32, %arg1: i32) -> (i32, i32, i32) {
    %c0_i32 = arith.constant 0 : i32
    %c0_i32_0 = arith.constant 0 : i32
    %c0_i32_1 = arith.constant 0 : i32
    return %arg0, %c0_i32, %c0_i32_0 : i32, i32, i32
  }
  func.func @transform_2(%arg0: i32, %arg1: i32) -> (i32, i32, i32) {
    %c0_i32 = arith.constant 0 : i32
    %c0_i32_0 = arith.constant 0 : i32
    %c0_i32_1 = arith.constant 0 : i32
    return %arg0, %c0_i32, %c0_i32_0 : i32, i32, i32
  }
  func.func @transform_3(%arg0: i32, %arg1: i32) -> (i32, i32) {
    %c0_i32 = arith.constant 0 : i32
    %c0_i32_0 = arith.constant 0 : i32
    return %c0_i32, %arg1 : i32, i32
  }
  func.func @transform_4(%arg0: i32, %arg1: i32) -> (i32, i32) {
    %c0_i32 = arith.constant 0 : i32
    %c0_i32_0 = arith.constant 0 : i32
    return %c0_i32, %arg1 : i32, i32
  }
  func.func @transform_5(%arg0: i32, %arg1: i32) -> (i32, i32) {
    %c0_i32 = arith.constant 0 : i32
    %c0_i32_0 = arith.constant 0 : i32
    return %c0_i32, %arg1 : i32, i32
  }
  func.func @transform_6(%arg0: i32, %arg1: i32) -> (i32, i32, i32) {
    %c0_i32 = arith.constant 0 : i32
    %c0_i32_0 = arith.constant 0 : i32
    return %arg0, %c0_i32, %arg1 : i32, i32, i32
  }
  func.func @transform_7(%arg0: i32, %arg1: i32) -> (i32, i32, i32, i32) {
    %c0_i32 = arith.constant 0 : i32
    %c0_i32_0 = arith.constant 0 : i32
    %c0_i32_1 = arith.constant 0 : i32
    return %arg0, %arg1, %c0_i32, %c0_i32_0 : i32, i32, i32, i32
  }
}

</mosaic_0001>

<bundles_post_ra>
// kernel: mha_forward.3
= control target key start
LH: loop header
LB: loop body
LE: loop exit
PB: predicated region body
PF: predicated region fallthrough
CT: control target
= control target key end

     0   :  { %vm29_vm0 = vcmask 261120   ;;  %s317_s0 = inlined_call_operand.vmem [shape: f32[16,32], index: 0, kind: input, shape index: {}]   ;;  %s318_s1 = inlined_call_operand.vmem [shape: f32[32,32], index: 1, kind: input, shape index: {}]   ;;  %s319_s2 = inlined_call_operand.vmem [shape: f32[16,32], index: 2, kind: input, shape index: {}]   ;;  %s320_s3 = inlined_call_operand.vmem [shape: f32[1,32], index: 3, kind: input, shape index: {}]   ;;  %s321_s4 = inlined_call_operand.vmem [shape: f32[1,32], index: 4, kind: input, shape index: {}]   ;;  %s322_s5 = inlined_call_operand.hbm [shape: f32[16,32], index: 5, kind: output, shape index: {}]  }
   0x1   :  { %v23_v0 = vld [vmem:[%s318_s1] sm:$0xff]  ;;  %v24_v1 = vld [vmem:[%s318_s1 + $0x8] sm:$0xff]  ;;  %v25_v2 = vld [vmem:[%s318_s1 + $0x10] sm:$0xff] }
   0x2   :  { %v195_v3 = vpack.c.bf16 %v24_v1, %v23_v0  ;;  %v26_v4 = vld [vmem:[%s318_s1 + $0x18] sm:$0xff]  ;;  %v21_v5 = vld [vmem:[%s317_s0] sm:$0xff] }
   0x3   :  { %v199_v6 = vpack.c.bf16 %v26_v4, %v25_v2  ;;  %192 = vmatprep.mubr.msk.f32.mxu0 %vm29_vm0, %v21_v5 }
   0x4   :  { %10 = vsyncpa [#allocation3], 0  ;;  %196 = vmatprep.subr.bf16.mxu0 %v195_v3  ;;  %v22_v7 = vld [vmem:[%s317_s0 + $0x8] sm:$0xff]  ;;  %v27_v8 = vld [vmem:[%s319_s2] sm:$0xff]  ;;  %s234_s10 = smov [#allocation2]  }
   0x5   :  { %198 = vmatpush3.bf16.msra.mxu0 %v195_v3  ;;  %v28_v10 = vld [vmem:[%s319_s2 + $0x8] sm:$0xff]  ;;  %v176_v33 = vld [vmem:[%s320_s3] ss:$0 sm:$0xff]  ;;  %s163_s11 = sshll.u32 %s234_s10, 4  ;;  %s164_s11 = int_to_ptr.vmem [resolvable:$true] %s163_s11 }
   0x6   :  { %200 = vmatprep.subr.bf16.mxu0 %v199_v6  ;;  %v177_v35 = vld [vmem:[%s321_s4] ss:$0 sm:$0xff]  ;;  %s210_s12 = scalar_lea.vmem %s164_s11, 256  ;;  %p215_p1 = scmp.lt.s32.totalorder %s164_s11, %s164_s11 }
   0x7   :  { %p211_p0 = scmp.ne.s32.totalorder %s164_s11, %s210_s12  ;;  %p216_p2 = scmp.lt.s32.totalorder %s210_s12, %s210_s12 }
   0x9   :  { %202 = vmatpush3.bf16.msra.mxu0 %v199_v6  ;;  %p217_p3 = por %p216_p2, %p215_p1 }
   0xb   :  { %p218_p4 = pnand %p217_p3, %p211_p0 }
   0xc   :  { %193 = vmatmul.mubr.msk.f32.vlgmr.msra.gmra.mrb[0].mxu0 %vm29_vm0, %v22_v7 }
  0xdf   :  { %v194_v9 = vpop.f32.mrb[0].mxu0 }
  0xe0   :  { %v102_v11 = vpop.f32.mrb[1].mxu0  ;;  %v108_v13 = vadd.f32 %v194_v9, %v28_v10 }
  0xe1   :  { %v103_v12 = vadd.f32 %v102_v11, %v27_v8 }
  0xe2   :  { %v114_v15 = vsel %vm29_vm0, %v108_v13, 0.0 }
  0xe3   :  { %v111_v14 = vsel %vm29_vm0, %v103_v12, 0.0 }
  0xe4   :  { %112 = vadd.xlane.f32.xlu0 %v111_v14 }
  0xe8   :  { %115 = vadd.xlane.f32.xlu0 %v114_v15 }
 0x171   :  { %v113_v16 = vpop.xlane.xlu0 %112 }
 0x172   :  { %v118_v17 = vmul.f32 0.03125, %v113_v16 }
 0x174   :  { %v120_v18 = vsub.f32 %v103_v12, %v118_v17 }
 0x175   :  { %v116_v19 = vpop.xlane.xlu0 %115 }
 0x176   :  { %v119_v20 = vmul.f32 0.03125, %v116_v19  ;;  %v122_v21 = vmul.f32 %v120_v18, %v120_v18 }
 0x178   :  { %v121_v22 = vsub.f32 %v108_v13, %v119_v20  ;;  %v124_v23 = vsel %vm29_vm0, %v122_v21, 0.0 }
 0x179   :  { %125 = vadd.xlane.f32.xlu1 %v124_v23 }
 0x17a   :  { %v123_v24 = vmul.f32 %v121_v22, %v121_v22 }
 0x17c   :  { %v127_v25 = vsel %vm29_vm0, %v123_v24, 0.0 }
 0x17d   :  { %128 = vadd.xlane.f32.xlu1 %v127_v25 }
 0x206   :  { %v126_v26 = vpop.xlane.xlu1 %125 }
 0x207   :  { %v130_v27 = vmul.f32 0.03125, %v126_v26 }
 0x209   :  { %v132_v28 = vadd.f32 1e-06, %v130_v27 }
 0x20a   :  { %v129_v29 = vpop.xlane.xlu1 %128 }
 0x20b   :  { %206 = vrsqrt.f32 %v132_v28  ;;  %v131_v30 = vmul.f32 0.03125, %v129_v29 }
 0x20d   :  { %v133_v31 = vadd.f32 1e-06, %v131_v30 }
 0x20f   :  { %208 = vrsqrt.f32 %v133_v31 }
 0x215   :  { %v207_v32 = vpop.eup %206 }
 0x216   :  { %v136_v34 = vmul.f32 %v207_v32, %v120_v18 }
 0x218   :  { %v145_v36 = vmul.f32 %v176_v33, %v136_v34 }
 0x219   :  { %v209_v37 = vpop.eup %208 }
 0x21a   :  { %v137_v38 = vmul.f32 %v209_v37, %v121_v22  ;;  %v154_v39 = vadd.f32 %v177_v35, %v145_v36 }
 0x21c   :  { %v146_v40 = vmul.f32 %v176_v33, %v137_v38  ;;  %156 = vst.msk [vmem:[#allocation2] sm:$0xff] %vm29_vm0, %v154_v39 }
 0x21e   :  { %v155_v41 = vadd.f32 %v177_v35, %v146_v40 }
 0x220   :  { %157 = vst.msk [vmem:[#allocation2 + $0x8] sm:$0xff] %vm29_vm0, %v155_v41 }
 0x221   :  { %221 = shalt.err (!%p218_p4)
}
 0x222   :  { %s222_s13 = scalar_lea.hbm %s322_s5, 256 }
 0x223   :  { %p223_p5 = scmp.ne.s32.totalorder %s322_s5, %s222_s13  ;;  %p226_p6 = scmp.lt.u32.totalorder %s222_s13, %s322_s5 }
 0x225   :  { %p228_p7 = pnand %p226_p6, %p223_p5 }
 0x227   :  { %231 = shalt.err (!%p228_p7)
}
 0x228   :  { %s235_s18 = smov 128   ;;  %s236_s19 = smov 8  }
 0x229   :  { %169 = dma.vmem_to_hbm [thread:$0]  %s164_s11, 256, %s322_s5, [#allocation3], %s235_s18, %s235_s18, %s236_s19  }
 0x22a   :  { %232 = dma.done.wait [#allocation3], 256  }
 0x22b   :  { %233 = vsyncadd [#allocation3], 4294967040 }
 0x22c   :  { %173 = vsyncpa [#allocation3], 1 }

// kernel: mha_forward.2
= control target key start
LH: loop header
LB: loop body
LE: loop exit
PB: predicated region body
PF: predicated region fallthrough
CT: control target
= control target key end

     0   :  { %s2579_s0 = inlined_call_operand.vmem [shape: f32[2,8,32], index: 0, kind: input, shape index: {}]   ;;  %s2580_s1 = inlined_call_operand.hbm [shape: f32[2,8,32], index: 1, kind: input, shape index: {}]   ;;  %s2581_s2 = inlined_call_operand.hbm [shape: f32[2,8,32], index: 2, kind: input, shape index: {}]   ;;  %s2582_s3 = inlined_call_operand.hbm [shape: f32[32,32], index: 3, kind: input, shape index: {}]   ;;  %s2583_s4 = inlined_call_operand.hbm [shape: f32[32,32], index: 4, kind: input, shape index: {}]   ;;  %s2584_s5 = inlined_call_operand.hbm [shape: f32[32,32], index: 5, kind: input, shape index: {}]   ;;  %s2585_s6 = inlined_call_operand.vmem [shape: f32[2,8,32], index: 6, kind: output, shape index: {0}]   ;;  %s2586_s7 = inlined_call_operand.hbm [shape: f32[2,4,8,8], index: 7, kind: output, shape index: {1}]  }
   0x1   :  { %2593 = sst [smem:[#allocation19_spill]] %s2582_s3 }
   0x2   :  { %2594 = sst [smem:[#allocation20_spill]] %s2583_s4 }
   0x3   :  { %2595 = sst [smem:[#allocation21_spill]] %s2584_s5 }
   0x4   :  { %2596 = sst [smem:[#allocation22_spill]] %s2585_s6 }
   0x5   :  { %13 = vsyncpa [#allocation3], 0 }
   0x6   :  { %15 = vsyncpa [#allocation3 + $0x1], 0 }
   0x7   :  { %16 = vsyncpa [#allocation6], 0 }
   0x8   :  { %18 = vsyncpa [#allocation6 + $0x1], 0 }
   0x9   :  { %19 = vsyncpa [#allocation9], 0 }
   0xa   :  { %20 = vsyncpa [#allocation4], 0 }
   0xb   :  { %22 = vsyncpa [#allocation4 + $0x1], 0  ;;  %s2164_s24 = smov 0   ;;  %s2166_s25 = smov 0  }
   0xc   :  { %s2168_s26 = smov 0   ;;  %s2170_s27 = smov 0  }
   0xd   :  { %s2172_s28 = smov 0   ;;  %s2174_s29 = smov 0  }
   0xe LB: > { %2597 = sst [smem:[#allocation17_spill]] %s2084_s24  ;;  %s2195_s30 = sadd.s32 4294967295, %s2104_s29   ;;  %s2104_s29 = sphi %s2174_s29, %s28_s29   ;;  %s2100_s28 = sphi %s2172_s28, %s2626_s28   ;;  %s2096_s27 = sphi %s2170_s27, %s2625_s27   ;;  %s2092_s26 = sphi %s2168_s26, %s2624_s26   ;;  %s2088_s25 = sphi %s2166_s25, %s2623_s25   ;;  %s2084_s24 = sphi %s2164_s24, %s2622_s24  }
   0xf   : > { %s1575_s8 = sadd.s32 4294967294, %s2104_s29   ;;  %p86_p0 = scmp.ne.s32.totalorder %s2088_s25, %s2084_s24 }
  0x10   : > { %p2587_p1 = scmp.eq.s32.totalorder %s2195_s30, 0  ;;  %p250_p3 = scmp.eq.s32.totalorder %s1575_s8, 1 }
  0x11   : > { %p1576_p5 = scmp.ge.s32.totalorder %s2104_s29, 1  ;;  %p257_p7 = scmp.lt.s32.totalorder %s2104_s29, 3 }
  0x12   : > { %p2204_p4 = por %p2587_p1, %p86_p0  ;;  %p2209_p6 = por %p250_p3, %p86_p0 }
  0x13   : > { %p2214_p8 = pnand %p1576_p5, %p257_p7  ;;  %s2106_s12 = smov [#allocation7]  }
  0x14   : > { %s2598_s9 = scalar_select %p2204_p4, 1, 0 }
  0x15   : > { %s2599_s10 = scalar_select %p2209_p6, 1, 0 }
  0x16   : > { %s2601_s11 = scalar_select %p2214_p8, 1, 0 }
  0x17   : > { %2600 = sst [smem:[#allocation18_spill]] %s2599_s10  ;;  %s271_s13 = sshll.u32 %s2106_s12, 4  ;;  %s2218_s13 = int_to_ptr.vmem [resolvable:$true] %s271_s13 }
  0x18   : > { %p1758_p9 = pneg %p2214_p8  ;;  %s2107_s15 = smov [#allocation8]  }
  0x19   : > { %s286_s16 = sshll.u32 %s2107_s15, 4  ;;  %s2108_s17 = smov [#allocation10]   ;;  %s2229_s16 = int_to_ptr.vmem [resolvable:$true] %s286_s16 }
  0x1a   : > { %p2225_p11 = pnand %p1758_p9, %p2587_p1  ;;  %s2231_s18 = sshll.u32 %s2108_s17, 4  ;;  %s302_s18 = int_to_ptr.vmem [resolvable:$true] %s2231_s18 }
  0x1b   : > { %s2603_s3 = sld [smem:[#allocation19_spill]] }
  0x1c   : > { %p2241_p13 = pneg %p2225_p11 }
  0x21   : > { %s1866_s21 = scalar_lea.hbm %s2603_s3, 512 }
  0x22   : > { %p1867_p12 = scmp.ne.s32.totalorder %s2603_s3, %s1866_s21  ;;  %p1873_p5 = scmp.lt.u32.totalorder %s1866_s21, %s2603_s3 }
  0x24   : > { %p1869_p0 = pnand %p2241_p13, %p1867_p12 }
  0x26   : > { %p1870_p3 = pneg %p1869_p0 }
  0x28   : > { %p1875_p7 = pnand %p1873_p5, %p1870_p3 }
  0x2a   : > { %1878 = shalt.err (!%p1875_p7)
}
  0x2b   : > { %s1879_s17 = scalar_lea.vmem %s2218_s13, 512  ;;  %p1887_p2 = scmp.lt.s32.totalorder %s2218_s13, %s2218_s13 }
  0x2c   : > { %p1880_p9 = scmp.ne.s32.totalorder %s2218_s13, %s1879_s17  ;;  %p1888_p6 = scmp.lt.s32.totalorder %s1879_s17, %s1879_s17 }
  0x2e   : > { %p1882_p10 = pnand %p1880_p9, %p2241_p13  ;;  %p1889_p12 = por %p1888_p6, %p1887_p2 }
  0x30   : > { %p1883_p1 = pneg %p1882_p10 }
  0x32   : > { %p1890_p0 = pnand %p1889_p12, %p1883_p1 }
  0x34   : > { %1893 = shalt.err (!%p1890_p0)
}
  0x35   : > { %s2109_s19 = smov 128   ;;  %s2110_s20 = smov 8  }
  0x36   : > { %1761 = dma.hbm_to_vmem [thread:$0]  (!%p2225_p11), %s2603_s3, 512, %s2218_s13, [#allocation6], %s2109_s19, %s2109_s19, %s2110_s20  }
  0x37   : > { %s2605_s4 = sld [smem:[#allocation20_spill]] }
  0x3d   : > { %s1894_s15 = scalar_lea.hbm %s2605_s4, 512 }
  0x3e   : > { %p1895_p1 = scmp.ne.s32.totalorder %s2605_s4, %s1894_s15  ;;  %p1901_p10 = scmp.lt.u32.totalorder %s1894_s15, %s2605_s4 }
  0x40   : > { %p1897_p2 = pnand %p1895_p1, %p2241_p13 }
  0x42   : > { %p1898_p6 = pneg %p1897_p2 }
  0x44   : > { %p1903_p3 = pnand %p1901_p10, %p1898_p6 }
  0x46   : > { %1906 = shalt.err (!%p1903_p3)
}
  0x47   : > { %s1907_s13 = scalar_lea.vmem %s2229_s16, 512  ;;  %p1915_p12 = scmp.lt.s32.totalorder %s2229_s16, %s2229_s16 }
  0x48   : > { %p1908_p5 = scmp.ne.s32.totalorder %s2229_s16, %s1907_s13  ;;  %p1916_p0 = scmp.lt.s32.totalorder %s1907_s13, %s1907_s13 }
  0x4a   : > { %p1910_p7 = pnand %p1908_p5, %p2241_p13  ;;  %p1917_p1 = por %p1916_p0, %p1915_p12 }
  0x4c   : > { %p1911_p9 = pneg %p1910_p7 }
  0x4e   : > { %p1918_p2 = pnand %p1917_p1, %p1911_p9 }
  0x50   : > { %1921 = shalt.err (!%p1918_p2)
}
  0x51   : > { %1764 = dma.hbm_to_vmem [thread:$0]  (!%p2225_p11), %s2605_s4, 512, %s2229_s16, [#allocation9], %s2109_s19, %s2109_s19, %s2110_s20  }
  0x52   : > { %s2606_s5 = sld [smem:[#allocation21_spill]] }
  0x58   : > { %s1922_s22 = scalar_lea.hbm %s2606_s5, 512 }
  0x59   : > { %p1923_p6 = scmp.ne.s32.totalorder %s2606_s5, %s1922_s22  ;;  %p1929_p5 = scmp.lt.u32.totalorder %s1922_s22, %s2606_s5 }
  0x5b   : > { %p1925_p10 = pnand %p1923_p6, %p2241_p13 }
  0x5d   : > { %p1926_p3 = pneg %p1925_p10 }
  0x5f   : > { %p1931_p7 = pnand %p1929_p5, %p1926_p3 }
  0x61   : > { %1934 = shalt.err (!%p1931_p7)
}
  0x62   : > { %s1935_s13 = scalar_lea.vmem %s302_s18, 512  ;;  %p1943_p1 = scmp.lt.s32.totalorder %s302_s18, %s302_s18 }
  0x63   : > { %p1936_p9 = scmp.ne.s32.totalorder %s302_s18, %s1935_s13  ;;  %p1944_p2 = scmp.lt.s32.totalorder %s1935_s13, %s1935_s13 }
  0x65   : > { %p1938_p12 = pnand %p1936_p9, %p2241_p13  ;;  %p1945_p4 = por %p1944_p2, %p1943_p1 }
  0x67   : > { %p1939_p0 = pneg %p1938_p12 }
  0x69   : > { %p1946_p8 = pnand %p1945_p4, %p1939_p0 }
  0x6b   : > { %1949 = shalt.err (!%p1946_p8)
}
  0x6c   : > { %1767 = dma.hbm_to_vmem [thread:$0]  (!%p2225_p11), %s2606_s5, 512, %s302_s18, [#allocation9], %s2109_s19, %s2109_s19, %s2110_s20  }
  0x6d   : > { %s73_s8 = sadd.s32 1, %s2092_s26  ;;  %s40_s14 = sadd.s32 1, %s2100_s28 }
  0x6e   : > { %p80_p4 = scmp.ne.s32.totalorder %s2092_s26, %s2088_s25  ;;  %p42_p8 = scmp.ge.s32.totalorder %s40_s14, 2 }
  0x6f   : > { %p81_p13 = scmp.eq.s32.totalorder %s2104_s29, 0  ;;  %p2607_p6 = scmp.eq.s32.totalorder %s2195_s30, 1 }
  0x70   : > { %p1782_p3 = scmp.lt.s32.totalorder %s2104_s29, 2  ;;  %s2628_s14 = smov (%p42_p8, %s40_s14), 0 }
  0x71   : > { %p2320_p10 = por %p2607_p6, %p80_p4  ;;  %p82_p5 = por %p81_p13, %p80_p4 }
  0x72   : > { %s322_s10 = sand.u32 1, %s2092_s26   ;;  %s70_s21 = ssub.s32 %s2100_s28, %s2628_s14 }
  0x73   : > { %s2608_s24 = scalar_select %p2320_p10, 1, 0 }
  0x74   : > { %p71_p11 = scmp.eq.s32.totalorder %s70_s21, 0  ;;  %s2330_s18 = sshll.u32 %s322_s10, 3 }
  0x75   : > { %s1582_s19 = sshll.u32 %s2100_s28, 7  ;;  %s326_s15 = scalar_lea.vmem [#allocation2], %s2330_s18 }
  0x76   : > { %s2334_s20 = scalar_select %p71_p11, %s2092_s26, %s73_s8  }
  0x77   : > { %s2339_s12 = scalar_lea.hbm %s2580_s1, %s1582_s19  ;;  %s333_s17 = sshll.u32 %s326_s15, 4  ;;  %s2342_s17 = int_to_ptr.vmem [resolvable:$true] %s333_s17 }
  0x78   : > { %p2346_p7 = pnand %p1782_p3, %p82_p5  ;;  %s2353_s8 = scalar_lea.hbm %s2581_s2, %s1582_s19 }
  0x79   : > { %s340_s21 = sand.u32 1, %s2104_s29   ;;  %s323_s22 = scalar_lea.sflag [#allocation3], %s322_s10 }
  0x7a   : > { %s1950_s23 = scalar_lea.hbm %s2339_s12, 128  ;;  %p1952_p12 = pneg %p2346_p7 }
  0x7b   : > { %p1951_p9 = scmp.ne.s32.totalorder %s2339_s12, %s1950_s23  ;;  %s1955_s4 = scalar_lea.hbm %s2580_s1, 256 }
  0x7c   : > { %p1956_p2 = scmp.lt.u32.totalorder %s2339_s12, %s2580_s1  ;;  %p1957_p4 = scmp.lt.u32.totalorder %s1955_s4, %s1950_s23 }
  0x7d   : > { %p1953_p0 = pnand %p1952_p12, %p1951_p9  ;;  %p1959_p13 = scmp.lt.u32.totalorder %s1950_s23, %s2339_s12 }
  0x7e   : > { %p1958_p8 = por %p1957_p4, %p1956_p2 }
  0x7f   : > { %p1954_p1 = pneg %p1953_p0 }
  0x80   : > { %p1960_p6 = por %p1959_p13, %p1958_p8 }
  0x82   : > { %p1961_p3 = pnand %p1960_p6, %p1954_p1 }
  0x84   : > { %1964 = shalt.err (!%p1961_p3)
}
  0x85   : > { %s1965_s10 = scalar_lea.vmem %s2342_s17, 128  ;;  %s2111_s3 = smov [#allocation2]  }
  0x86   : > { %p1966_p5 = scmp.ne.s32.totalorder %s2342_s17, %s1965_s10  ;;  %s1970_s19 = sshll.u32 %s2111_s3, 4  ;;  %s1971_s19 = int_to_ptr.vmem [resolvable:$false] %s1970_s19 }
  0x87   : > { %s1972_s5 = scalar_lea.vmem %s1971_s19, 256  ;;  %p1973_p0 = scmp.lt.s32.totalorder %s2342_s17, %s1971_s19 }
  0x88   : > { %p1968_p11 = pnand %p1966_p5, %p1952_p12  ;;  %p1974_p2 = scmp.lt.s32.totalorder %s1972_s5, %s1965_s10 }
  0x8a   : > { %p1969_p9 = pneg %p1968_p11  ;;  %p1975_p4 = por %p1974_p2, %p1973_p0 }
  0x8c   : > { %p1976_p8 = pnand %p1975_p4, %p1969_p9 }
  0x8e   : > { %1979 = shalt.err (!%p1976_p8)
}
  0x8f   : > { %1771 = dma.hbm_to_vmem [thread:$0]  (!%p2346_p7), %s2339_s12, 128, %s2342_s17, %s323_s22  }
  0x90   : > { %s344_s4 = scalar_lea.vmem [#allocation5], %s2330_s18  ;;  %s341_s23 = scalar_lea.sflag [#allocation6], %s340_s21 }
  0x91   : > { %s351_s6 = sshll.u32 %s344_s4, 4  ;;  %s1980_s15 = scalar_lea.hbm %s2353_s8, 128  ;;  %s352_s6 = int_to_ptr.vmem [resolvable:$true] %s351_s6 }
  0x92   : > { %p1981_p1 = scmp.ne.s32.totalorder %s2353_s8, %s1980_s15  ;;  %s1985_s3 = scalar_lea.hbm %s2581_s2, 256 }
  0x93   : > { %p1986_p3 = scmp.lt.u32.totalorder %s2353_s8, %s2581_s2  ;;  %p1987_p5 = scmp.lt.u32.totalorder %s1985_s3, %s1980_s15 }
  0x94   : > { %p1983_p13 = pnand %p1981_p1, %p1952_p12  ;;  %p1989_p9 = scmp.lt.u32.totalorder %s1980_s15, %s2353_s8 }
  0x95   : > { %p1988_p11 = por %p1987_p5, %p1986_p3 }
  0x96   : > { %p1984_p6 = pneg %p1983_p13 }
  0x97   : > { %p1990_p0 = por %p1989_p9, %p1988_p11 }
  0x99   : > { %p1991_p2 = pnand %p1990_p0, %p1984_p6 }
  0x9b   : > { %1994 = shalt.err (!%p1991_p2)
}
  0x9c   : > { %s1995_s18 = scalar_lea.vmem %s352_s6, 128  ;;  %s2112_s12 = smov [#allocation5]  }
  0x9d   : > { %p1996_p4 = scmp.ne.s32.totalorder %s352_s6, %s1995_s18  ;;  %s2000_s17 = sshll.u32 %s2112_s12, 4  ;;  %s2001_s17 = int_to_ptr.vmem [resolvable:$false] %s2000_s17 }
  0x9e   : > { %s2002_s21 = scalar_lea.vmem %s2001_s17, 256  ;;  %p2003_p13 = scmp.lt.s32.totalorder %s352_s6, %s2001_s17 }
  0x9f   : > { %p1998_p8 = pnand %p1996_p4, %p1952_p12  ;;  %p2004_p10 = scmp.lt.s32.totalorder %s2002_s21, %s1995_s18 }
  0xa1   : > { %p1999_p1 = pneg %p1998_p8  ;;  %p2005_p3 = por %p2004_p10, %p2003_p13 }
  0xa3   : > { %p2006_p5 = pnand %p2005_p3, %p1999_p1 }
  0xa5   : > { %2009 = shalt.err (!%p2006_p5)
}
  0xa6   : > { %1774 = dma.hbm_to_vmem [thread:$0]  (!%p2346_p7), %s2353_s8, 128, %s352_s6, %s341_s23  }
  0xa7   : > { %p2610_p6 = scmp.ne.s32.totalorder %s2601_s11, 0 }
  0xa8   : > { %s2406_s22 = sand.u32 (!%p2610_p6), 1, %s2088_s25   ;;  %p2611_p10 = scmp.ne.s32.totalorder (!%p2610_p6), %s2598_s9, 0 }
  0xa9   : > { %360 = sbr.rel (%p2610_p6) target bundleno = 1391 (0x56f), region = 44  ;;  %s1586_s4 = sshll.u32 (!%p2610_p6), %s2406_s22, 3 }
  0xaa   : > { %s363_s15 = scalar_lea.sflag (!%p2610_p6), [#allocation3], %s2406_s22  ;;  %s2410_s16 = scalar_lea.vmem (!%p2610_p6), [#allocation2], %s1586_s4 }
  0xb0   : > { %2063 = dma.done.wait (%p2611_p10), %s363_s15, 128  }
  0xb1   : > { %2065 = vsyncadd (%p2611_p10), %s363_s15, 4294967168  ;;  %s371_s13 = sand.u32 1, %s2195_s30   ;;  %s2417_s8 = scalar_lea.vmem [#allocation5], %s1586_s4 }
  0xb2   : > { %s372_s11 = scalar_lea.sflag [#allocation6], %s371_s13 }
  0xb3   : > { %2067 = dma.done.wait (%p2611_p10), %s372_s11, 128  }
  0xb4   : > { %2069 = vsyncadd (%p2611_p10), %s372_s11, 4294967168  ;;  %p2612_p7 = scmp.eq.s32.totalorder %s2195_s30, 0 }
  0xb6   : > { %2071 = dma.done.wait (%p2612_p7), [#allocation6], 512   ;;  %p2613_p12 = pmov %p2612_p7 }
  0xb7   : > { %p2614_p11 = pmov %p2612_p7 }
  0xb8   : > { %2073 = vsyncadd (%p2613_p12), [#allocation6], 4294966784 }
  0xb9   : > { %2075 = dma.done.wait (%p2614_p11), [#allocation9], 1024   ;;  %p2615_p9 = pmov %p2612_p7 }
  0xba   : > { %v2113_v0 = vmov 0.0|0.0   ;;  %p434_p0 = scmp.lt.s32.totalorder %s2096_s27, 1  ;;  %vm2114_vm0 = vmmov 0   ;;  %v2115_v1 = vmov 0.0   ;;  %v526_v2 = vld [vmem:[#allocation8] sm:$0xff]  ;;  %v527_v3 = vld [vmem:[#allocation8 + $0x8] sm:$0xff] }
  0xbb   : > { %2077 = vsyncadd (%p2615_p9), [#allocation9], 4294966272  ;;  %1728 = vmatprep.subr.bf16.mxu1 %v2113_v0  ;;  %1722 = vmatprep.subr.bf16.mxu0 %v2113_v0  ;;  %v447_v4 = vld [vmem:[#allocation7] sm:$0xff]  ;;  %v1729_v5 = vpack.c.bf16 %v527_v3, %v526_v2  ;;  %v448_v6 = vld [vmem:[#allocation7 + $0x8] sm:$0xff]  ;;  %vm451_vm1 = vcmask 261120   ;;  %vm682_vm2 = vcmask 64512  }
  0xbc   : > { %1668 = vmatprep.mubr.msk.f32.mxu1 %vm2114_vm0, %v2115_v1  ;;  %1657 = vmatprep.mubr.msk.f32.mxu0 %vm2114_vm0, %v2115_v1  ;;  %s2437_s9 = scalar_select %p434_p0, %s2096_s27, 1  ;;  %v528_v7 = vld [vmem:[#allocation8 + $0x10] sm:$0xff]  ;;  %v529_v8 = vld [vmem:[#allocation8 + $0x18] sm:$0xff]  ;;  %v1723_v9 = vpack.c.bf16 %v448_v6, %v447_v4  ;;  %v525_v14 = vld [vmem:[%s2410_s16] sm:$0xff] }
  0xbd   : > { %v449_v10 = vld [vmem:[#allocation7 + $0x10] sm:$0xff]  ;;  %v450_v11 = vld [vmem:[#allocation7 + $0x18] sm:$0xff]  ;;  %1730 = vmatpush3.bf16.msra.mxu1 %v1729_v5  ;;  %v1732_v12 = vpack.c.bf16 %v529_v8, %v528_v7  ;;  %v604_v16 = vld [vmem:[#allocation10] sm:$0xff]  ;;  %s2116_s3 = smov 112   ;;  %s2117_s19 = smov 120  }
  0xbe   : > { %s1592_s30 = sshll.u32 %s2437_s9, 3  ;;  %1724 = vmatpush3.bf16.msra.mxu0 %v1723_v9  ;;  %1731 = vmatprep.subr.bf16.mxu1 %v2113_v0  ;;  %v1726_v13 = vpack.c.bf16 %v450_v11, %v449_v10  ;;  %v605_v17 = vld [vmem:[#allocation10 + $0x8] sm:$0xff]  ;;  %v606_v18 = vld [vmem:[#allocation10 + $0x10] sm:$0xff]  ;;  %v607_v20 = vld [vmem:[#allocation10 + $0x18] sm:$0xff]  ;;  %s2118_s5 = smov 104  }
  0xbf   : > { %1725 = vmatprep.subr.bf16.mxu0 %v2113_v0  ;;  %s437_s10 = scalar_lea.vmem %s2579_s0, %s1592_s30  ;;  %v1735_v19 = vpack.c.bf16 %v605_v17, %v604_v16  ;;  %v1738_v21 = vpack.c.bf16 %v607_v20, %v606_v18  ;;  %v603_v22 = vld [vmem:[%s2417_s8] sm:$0xff]  ;;  %s1591_s18 = sshll.u32 %s2406_s22, 5 }
  0xc0   : > { %v446_v15 = vld [vmem:[%s437_s10] sm:$0xff]  ;;  %s2494_s12 = scalar_lea.vmem [#allocation11], %s1591_s18  ;;  %s1617_s17 = sshll.u32 %s2096_s27, 9 }
  0xc1   : > { %1733 = vmatpush3.bf16.msra.mxu1 %v1732_v12  ;;  %s1390_s21 = sshll.u32 %s2494_s12, 4  ;;  %s2521_s16 = scalar_lea.hbm %s2586_s7, %s1617_s17  ;;  %s2523_s21 = int_to_ptr.vmem [resolvable:$true] %s1390_s21 }
  0xc2   : > { %1727 = vmatpush3.bf16.msra.mxu0 %v1726_v13  ;;  %1682 = vmatprep.subr.mxu1 %v2115_v1  ;;  %s1372_s13 = scalar_lea.sflag [#allocation4], %s2406_s22  ;;  %s2010_s11 = scalar_lea.vmem %s2523_s21, 512 }
  0xc3   : > { %1734 = vmatprep.subr.bf16.mxu0 %v2113_v0  ;;  %p2011_p2 = scmp.ne.s32.totalorder %s2523_s21, %s2010_s11  ;;  %p2616_p4 = scmp.ne.s32.totalorder %s2608_s24, 0 }
  0xc4   : > { %1669 = vmatmul.mubr.msk.f32.vlgmr.msra.gmra.mrb[0].mxu1 %vm451_vm1, %v525_v14  ;;  %s2119_s8 = smov [#allocation11]  }
  0xc5   : > { %1658 = vmatmul.mubr.msk.f32.vlgmr.msra.gmra.mrb[0].mxu0 %vm451_vm1, %v446_v15  ;;  %1684 = vmatprep.mubr.msk.f32.mxu1 %vm2114_vm0, %v2115_v1  ;;  %p2012_p8 = pnand %p2011_p2, %p2616_p4  ;;  %s2014_s6 = sshll.u32 %s2119_s8, 4  ;;  %s2015_s6 = int_to_ptr.vmem [resolvable:$false] %s2014_s6 }
  0xc6   : > { %1679 = vmatprep.mubr.msk.f32.mxu0 %vm2114_vm0, %v2115_v1  ;;  %1736 = vmatpush3.bf16.msra.mxu0 %v1735_v19  ;;  %s2016_s27 = scalar_lea.vmem %s2015_s6, 1024  ;;  %p2017_p13 = scmp.lt.s32.totalorder %s2523_s21, %s2015_s6 }
  0xc7   : > { %1737 = vmatprep.subr.bf16.mxu0 %v2113_v0  ;;  %p2013_p1 = pneg %p2012_p8  ;;  %p2018_p3 = scmp.lt.s32.totalorder %s2016_s27, %s2010_s11 }
  0xc9   : > { %p2019_p5 = por %p2018_p3, %p2017_p13 }
  0xca   : > { %1739 = vmatpush3.bf16.msra.mxu0 %v1738_v21 }
  0xcb   : > { %1692 = vmatprep.subr.mxu0 %v2115_v1  ;;  %p2020_p6 = pnand %p2019_p5, %p2013_p1 }
  0xcd   : > { %1680 = vmatmul.mubr.msk.f32.vlgmr.msra.gmra.mrb[2].mxu0 %vm451_vm1, %v603_v22 }
  0xce   : > { %1694 = vmatprep.mubr.msk.f32.mxu0 %vm2114_vm0, %v2115_v1 }
 0x197   : > { %v599_v23 = vpop.f32.mrb[0].mxu1 }
 0x198   : > { %1014 = vrot.lane.b32.xlu1 %v599_v23, %s2116_s3  ;;  %846 = vrot.lane.b32.xlu0 %v599_v23, %s2117_s19  ;;  %v521_v24 = vpop.f32.mrb[0].mxu0  ;;  %v1670_v25 = vpop.f32.mrb[1].mxu1 }
 0x199   : > { %v681_v26 = vmul.f32 0.35355338, %v521_v24  ;;  %1683 = vmatpush3.xpose.msk.msra.mxu1 %vm682_vm2, %v599_v23  ;;  %v1659_v27 = vpop.f32.mrb[1].mxu0 }
 0x19a   : > { %1687 = vmatprep.subr.mxu1 %v2115_v1 }
 0x19c   : > { %1685 = vmatmul.mubr.msk.f32.vlgmr.msra.gmra.mrb[2].mxu1 %vm682_vm2, %v681_v26  ;;  %1012 = vrot.lane.b32.xlu1 %v681_v26, %s2116_s3 }
 0x19d   : > { %844 = vrot.lane.b32.xlu0 %v681_v26, %s2117_s19  ;;  %1689 = vmatprep.mubr.msk.f32.mxu1 %vm2114_vm0, %v2115_v1 }
 0x1a0   : > { %1179 = vrot.lane.b32.xlu1 %v681_v26, %s2118_s5  ;;  %v677_v34 = vpop.f32.mrb[2].mxu0 }
 0x1a1   : > { %1181 = vrot.lane.b32.xlu0 %v599_v23, %s2118_s5  ;;  %v1681_v35 = vpop.f32.mrb[3].mxu0  ;;  %1688 = vmatpush3.msra.mxu1 %v677_v34 }
 0x1a2   : > { %1697 = vmatprep.subr.mxu1 %v2115_v1 }
 0x20a   : > { %v847_v28 = vpop.permute.xlu0 %846  ;;  %v1015_v29 = vpop.permute.xlu1 %1014 }
 0x20b   : > { %1693 = vmatpush3.xpose.msk.msra.mxu0 %vm682_vm2, %v847_v28 }
 0x20c   : > { %1702 = vmatprep.subr.mxu0 %v2115_v1 }
 0x20e   : > { %v1013_v31 = vpop.permute.xlu1 %1012 }
 0x20f   : > { %v845_v30 = vpop.permute.xlu0 %844 }
 0x210   : > { %1695 = vmatmul.mubr.msk.f32.vlgmr.msra.gmra.mrb[4].mxu0 %vm682_vm2, %v845_v30 }
 0x211   : > { %1703 = vmatpush3.xpose.msk.msra.mxu0 %vm682_vm2, %v1015_v29  ;;  %1704 = vmatprep.mubr.msk.f32.mxu0 %vm2114_vm0, %v2115_v1 }
 0x212   : > { %1712 = vmatprep.subr.mxu0 %v2115_v1  ;;  %v1180_v33 = vpop.permute.xlu1 %1179 }
 0x213   : > { %v1182_v32 = vpop.permute.xlu0 %1181 }
 0x214   : > { %1705 = vmatmul.mubr.msk.f32.vlgmr.msra.gmra.mrb[6].mxu0 %vm682_vm2, %v1013_v31 }
 0x215   : > { %1713 = vmatpush3.xpose.msk.msra.mxu0 %vm682_vm2, %v1182_v32  ;;  %1714 = vmatprep.mubr.msk.f32.mxu0 %vm2114_vm0, %v2115_v1 }
 0x218   : > { %1715 = vmatmul.mubr.msk.f32.vlgmr.msra.gmra.mrb[8].mxu0 %vm682_vm2, %v1180_v33 }
 0x26f   : > { %v755_v36 = vpop.f32.mrb[2].mxu1 }
 0x270   : > { %v1686_v37 = vpop.f32.mrb[3].mxu1  ;;  %v759_v38 = vsel %vm682_vm2, %v755_v36, -inf }
 0x271   : > { %760 = vmax.xlane.f32.xlu0 %v759_v38 }
 0x2e3   : > { %v918_v39 = vpop.f32.mrb[4].mxu0 }
 0x2e4   : > { %v1696_v40 = vpop.f32.mrb[5].mxu0  ;;  %v922_v41 = vsel %vm682_vm2, %v918_v39, -inf }
 0x2e5   : > { %923 = vmax.xlane.f32.xlu1 %v922_v41 }
 0x2e7   : > { %v1086_v42 = vpop.f32.mrb[6].mxu0 }
 0x2e8   : > { %v1706_v43 = vpop.f32.mrb[7].mxu0  ;;  %v1090_v44 = vsel %vm682_vm2, %v1086_v42, -inf }
 0x2e9   : > { %1091 = vmax.xlane.f32.xlu0 %v1090_v44 }
 0x2eb   : > { %v1253_v45 = vpop.f32.mrb[8].mxu0 }
 0x2ec   : > { %v1716_v46 = vpop.f32.mrb[9].mxu0  ;;  %v1257_v47 = vsel %vm682_vm2, %v1253_v45, -inf }
 0x2ed   : > { %1258 = vmax.xlane.f32.xlu0 %v1257_v47 }
 0x2f6   : > { %936 = vrot.lane.b32.xlu1 %v677_v34, %s2117_s19 }
 0x2fe   : > { %v761_v48 = vpop.xlane.xlu0 %760 }
 0x2ff   : > { %v762_v49 = vsub.f32 %v755_v36, %v761_v48 }
 0x301   : > { %v763_v50 = vmul.f32 1.442695, %v762_v49 }
 0x303   : > { %1850 = vpow2.f32 %v763_v50 }
 0x30d   : > { %v1851_v51 = vpop.eup %1850 }
 0x30e   : > { %v765_v52 = vsel %vm682_vm2, %v1851_v51, 0.0 }
 0x31a   : > { %766 = vadd.xlane.f32.xlu1 %v765_v52 }
 0x372   : > { %v924_v53 = vpop.xlane.xlu1 %923 }
 0x373   : > { %v925_v54 = vsub.f32 %v918_v39, %v924_v53 }
 0x375   : > { %v926_v55 = vmul.f32 1.442695, %v925_v54 }
 0x376   : > { %v1092_v56 = vpop.xlane.xlu0 %1091  ;;  %v937_v5 = vpop.permute.xlu1 %936 }
 0x377   : > { %1852 = vpow2.f32 %v926_v55  ;;  %v1093_v57 = vsub.f32 %v1086_v42, %v1092_v56 }
 0x379   : > { %v1094_v58 = vmul.f32 1.442695, %v1093_v57 }
 0x37a   : > { %v1259_v59 = vpop.xlane.xlu0 %1258 }
 0x37b   : > { %1854 = vpow2.f32 %v1094_v58  ;;  %v1260_v60 = vsub.f32 %v1253_v45, %v1259_v59 }
 0x37d   : > { %v1261_v61 = vmul.f32 1.442695, %v1260_v60 }
 0x37f   : > { %1856 = vpow2.f32 %v1261_v61 }
 0x381   : > { %v1853_v62 = vpop.eup %1852 }
 0x382   : > { %v928_v63 = vsel %vm682_vm2, %v1853_v62, 0.0 }
 0x383   : > { %929 = vadd.xlane.f32.xlu0 %v928_v63 }
 0x385   : > { %v1855_v0 = vpop.eup %1854 }
 0x386   : > { %v1096_v2 = vsel %vm682_vm2, %v1855_v0, 0.0 }
 0x387   : > { %1097 = vadd.xlane.f32.xlu1 %v1096_v2 }
 0x389   : > { %v1857_v3 = vpop.eup %1856 }
 0x38a   : > { %v1263_v4 = vsel %vm682_vm2, %v1857_v3, 0.0 }
 0x38b   : > { %1264 = vadd.xlane.f32.xlu0 %v1263_v4 }
 0x398   : > { %1270 = vrot.lane.b32.xlu1 %v677_v34, %s2118_s5 }
 0x3a1   : > { %1103 = vrot.lane.b32.xlu0 %v677_v34, %s2116_s3 }
 0x3a7   : > { %v767_v6 = vpop.xlane.xlu1 %766 }
 0x3a8   : > { %1858 = vrcp.f32 %v767_v6 }
 0x3b2   : > { %v1859_v7 = vpop.eup %1858 }
 0x3b3   : > { %v769_v8 = vmul.f32 %v1859_v7, %v1851_v51 }
 0x3b5   : > { %770 = vst.msk [vmem:[%s2494_s12] sm:$0xff] %vm682_vm2, %v769_v8  ;;  %1690 = vmatmul.mubr.msk.f32.vlgmr.msra.gmra.mrb[4].mxu1 %vm682_vm2, %v769_v8 }
 0x3b6   : > { %1698 = vmatpush3.msra.mxu1 %v937_v5  ;;  %1699 = vmatprep.mubr.msk.f32.mxu1 %vm2114_vm0, %v2115_v1 }
 0x3b7   : > { %1707 = vmatprep.subr.mxu1 %v2115_v1 }
 0x410   : > { %v930_v9 = vpop.xlane.xlu0 %929 }
 0x411   : > { %1860 = vrcp.f32 %v930_v9 }
 0x414   : > { %v1098_v10 = vpop.xlane.xlu1 %1097 }
 0x415   : > { %1862 = vrcp.f32 %v1098_v10 }
 0x418   : > { %v1265_v11 = vpop.xlane.xlu0 %1264  ;;  %v1271_v17 = vpop.permute.xlu1 %1270 }
 0x419   : > { %1864 = vrcp.f32 %v1265_v11 }
 0x41b   : > { %v1861_v12 = vpop.eup %1860 }
 0x41c   : > { %v932_v13 = vmul.f32 %v1861_v12, %v1853_v62  ;;  %v1104_v14 = vpop.permute.xlu0 %1103 }
 0x41e   : > { %1602 = vst.msk [vmem:[%s2494_s12 + $0x8] sm:$0xff] %vm682_vm2, %v932_v13  ;;  %1700 = vmatmul.mubr.msk.f32.vlgmr.msra.gmra.mrb[6].mxu1 %vm682_vm2, %v932_v13 }
 0x41f   : > { %v1863_v15 = vpop.eup %1862  ;;  %1708 = vmatpush3.msra.mxu1 %v1104_v14  ;;  %1709 = vmatprep.mubr.msk.f32.mxu1 %vm2114_vm0, %v2115_v1 }
 0x420   : > { %v1100_v16 = vmul.f32 %v1863_v15, %v1855_v0  ;;  %1717 = vmatprep.subr.mxu1 %v2115_v1 }
 0x422   : > { %1606 = vst.msk [vmem:[%s2494_s12 + $0x10] sm:$0xff] %vm682_vm2, %v1100_v16  ;;  %1710 = vmatmul.mubr.msk.f32.vlgmr.msra.gmra.mrb[8].mxu1 %vm682_vm2, %v1100_v16 }
 0x423   : > { %v1865_v18 = vpop.eup %1864  ;;  %1718 = vmatpush3.msra.mxu1 %v1271_v17  ;;  %1719 = vmatprep.mubr.msk.f32.mxu1 %vm2114_vm0, %v2115_v1 }
 0x424   : > { %v1267_v19 = vmul.f32 %v1865_v18, %v1857_v3 }
 0x426   : > { %1610 = vst.msk [vmem:[%s2494_s12 + $0x18] sm:$0xff] %vm682_vm2, %v1267_v19  ;;  %1720 = vmatmul.mubr.msk.f32.vlgmr.msra.gmra.mrb[10].mxu1 %vm682_vm2, %v1267_v19 }
 0x488   : > { %v840_v20 = vpop.f32.mrb[4].mxu1 }
 0x489   : > { %v1691_v21 = vpop.f32.mrb[5].mxu1 }
 0x48a   : > { %2023 = shalt.err (!%p2020_p6)
}
 0x48b   : > { %s2024_s23 = scalar_lea.hbm %s2521_s16, 512  ;;  %s2028_s19 = scalar_lea.hbm %s2586_s7, 1024 }
 0x48c   : > { %p2025_p10 = scmp.ne.s32.totalorder %s2521_s16, %s2024_s23  ;;  %p2029_p11 = scmp.lt.u32.totalorder %s2521_s16, %s2586_s7 }
 0x48d   : > { %p2030_p9 = scmp.lt.u32.totalorder %s2028_s19, %s2024_s23  ;;  %p2032_p2 = scmp.lt.u32.totalorder %s2024_s23, %s2521_s16 }
 0x48e   : > { %p2026_p7 = pnand %p2025_p10, %p2616_p4 }
 0x48f   : > { %p2031_p0 = por %p2030_p9, %p2029_p11 }
 0x490   : > { %p2027_p12 = pneg %p2026_p7 }
 0x491   : > { %p2033_p8 = por %p2032_p2, %p2031_p0 }
 0x493   : > { %p2034_p1 = pnand %p2033_p8, %p2027_p12 }
 0x495   : > { %2037 = shalt.err (!%p2034_p1)
}
 0x496   : > { %s2120_s12 = smov 128   ;;  %s2121_s17 = smov 8   ;;  %vm1359_vm3 = vcmask 130048   ;;  %vm1361_vm4 = vcmask 195584  }
 0x497   : > { %1756 = dma.vmem_to_hbm [thread:$0]  (%p2616_p4), %s2523_s21, 512, %s2521_s16, %s1372_s13, %s2120_s12, %s2120_s12, %s2121_s17  }
 0x498   : > { %s2122_s4 = smov 16   ;;  %s2123_s15 = smov 24  }
 0x499   : > { %s2617_s21 = sld [smem:[#allocation22_spill]] }
 0x49f   : > { %s444_s16 = scalar_lea.vmem %s2617_s21, %s1592_s30 }
 0x4f1   : > { %v1008_v1 = vpop.f32.mrb[6].mxu1 }
 0x4f2   : > { %1347 = vrot.lane.b32.xlu1 %v1008_v1, %s2121_s17  ;;  %v1701_v22 = vpop.f32.mrb[7].mxu1 }
 0x4f5   : > { %v1175_v23 = vpop.f32.mrb[8].mxu1 }
 0x4f6   : > { %1351 = vrot.lane.b32.xlu0 %v1175_v23, %s2122_s4  ;;  %v1711_v24 = vpop.f32.mrb[9].mxu1 }
 0x4f9   : > { %v1342_v25 = vpop.f32.mrb[10].mxu1 }
 0x4fa   : > { %1355 = vrot.lane.b32.xlu1 %v1342_v25, %s2123_s15  ;;  %v1721_v26 = vpop.f32.mrb[11].mxu1 }
 0x564   : > { %v1348_v27 = vpop.permute.xlu1 %1347 }
 0x565   : > { %v1358_v29 = vsel %vm682_vm2, %v840_v20, %v1348_v27 }
 0x568   : > { %v1352_v28 = vpop.permute.xlu0 %1351 }
 0x569   : > { %v1360_v30 = vsel %vm1359_vm3, %v1358_v29, %v1352_v28 }
 0x56c   : > { %v1356_v31 = vpop.permute.xlu1 %1355 }
 0x56d   : > { %v1362_v32 = vsel %vm1361_vm4, %v1360_v30, %v1356_v31 }
 0x56e   : > { %1363 = vst.msk [vmem:[%s444_s16] sm:$0xff] %vm451_vm1, %v1362_v32 }
 0x56f PF: > { %s2618_s13 = sld [smem:[#allocation17_spill]]  ;;  %s2619_s11 = sld [smem:[#allocation18_spill]] }
 0x570   : > { %p2621_p13 = scmp.ge.s32.totalorder %s2104_s29, 2 }
 0x575   : > { %s1415_s8 = sand.u32 1, %s2618_s13   ;;  %p2620_p4 = scmp.ne.s32.totalorder %s2619_s11, 0 }
 0x576   : > { %s1416_s9 = scalar_lea.sflag [#allocation4], %s1415_s8 }
 0x577   : > { %p1776_p3 = pnand %p2621_p13, %p2620_p4 }
 0x579   : > { %2079 = dma.done.wait (!%p1776_p3), %s1416_s9, 512  }
 0x57a   : > { %2081 = vsyncadd (!%p1776_p3), %s1416_s9, 4294966784  ;;  %s28_s29 = sadd.s32 1, %s2104_s29   ;;  %s2622_s24 = smov %s2088_s25 }
 0x57b   : > { %p25_p5 = scmp.ge.s32.totalorder %s28_s29, 4   ;;  %s2623_s25 = smov %s2092_s26 }
 0x57c   : > { %s2624_s26 = smov %s2334_s20  ;;  %s2625_s27 = smov %s2100_s28 }
 0x57d   : > { %s2626_s28 = smov %s2628_s14  ;;  %27 = sbr.rel (!%p25_p5) target bundleno = 14 (0xe), region = 135 }
 0x584   :  { %1421 = vsyncpa [#allocation3], 1 }
 0x585   :  { %1423 = vsyncpa [#allocation3 + $0x1], 1 }
 0x586   :  { %1424 = vsyncpa [#allocation6], 1 }
 0x587   :  { %1426 = vsyncpa [#allocation6 + $0x1], 1 }
 0x588   :  { %1427 = vsyncpa [#allocation9], 1 }
 0x589   :  { %1428 = vsyncpa [#allocation4], 1 }
 0x58a   :  { %1430 = vsyncpa [#allocation4 + $0x1], 1 }

</bundles_post_ra>
